<compile_context>
chip_gen: v5e
topology: v5e:2x2
jax: 0.10.0
libtpu: 0.0.40
codegen_flags: <defaults>
</compile_context>

<pallas_src>
import jax
import jax.numpy as jnp
from jax.experimental import pallas as pl
from jax.experimental.pallas import tpu as pltpu


def _avdn_mixer_kernel(state_ref, qs_ref, w1_ref, b1_ref, w2_ref, b2_ref, out_ref):
    # state_ref: (TR, S)   qs_ref: (TR, A)
    # w1_ref: (S, E)  b1_ref: (1, E)  w2_ref: (E, A)  b2_ref: (1, A)
    # out_ref: (1, TR)   <- lane-dense output (one per-row scalar per lane)
    x = state_ref[...]

    # Linear1 + ReLU (MXU consumes native dtype; accumulate in f32)
    h = jnp.dot(x, w1_ref[...], preferred_element_type=jnp.float32)
    h = jnp.maximum(h + b1_ref[...].astype(jnp.float32), 0.0)

    # Linear2
    logits = jnp.dot(h, w2_ref[...], preferred_element_type=jnp.float32)
    logits = logits + b2_ref[...].astype(jnp.float32)

    # Numerically-stable softmax folded into the final reduction:
    #   sum(softmax(logits) * qs * 5) = 5 * sum(e * qs) / sum(e)
    m = jnp.max(logits, axis=-1, keepdims=True)
    e = jnp.exp(logits - m)
    qs = qs_ref[...].astype(jnp.float32)

    num = jnp.sum(e * qs, axis=-1)   # (TR,)
    den = jnp.sum(e, axis=-1)        # (TR,)
    out_ref[...] = (5.0 * num / den).reshape(out_ref.shape)


def _round_up(x, m):
    return ((x + m - 1) // m) * m


def avdn_mixer(agent_qs, batch_state, w1, b1, w2, b2, *, tile_rows=512):
    """agent_qs: (bs, seq, n_agents); batch_state: (bs, seq, state_dim) -> (bs, seq, 1).

    Weights use (in, out) layout (equivalent to PyTorch's x @ W.T with W transposed).
    Inputs may be f32 or bf16; compute/accumulation is f32.
    """
    bs, seq, n_agents = agent_qs.shape
    state_dim = batch_state.shape[-1]
    embed_dim = w1.shape[1]
    rows = bs * seq

    # Tile size: multiple of 128 (lane-dense output), no bigger than needed.
    # For v7x keep the grid length >= 2 for realistic workloads so both
    # TensorCores are fed via the "parallel" grid axis.
    tile_rows = min(tile_rows, _round_up(rows, 128))
    tile_rows = _round_up(tile_rows, 128)
    padded_rows = _round_up(rows, tile_rows)
    num_tiles = padded_rows // tile_rows

    qs_flat = agent_qs.reshape(rows, n_agents)
    st_flat = batch_state.reshape(rows, state_dim)
    if padded_rows != rows:
        pad = padded_rows - rows
        qs_flat = jnp.pad(qs_flat, ((0, pad), (0, 0)))
        st_flat = jnp.pad(st_flat, ((0, pad), (0, 0)))

    b1_2d = b1.reshape(1, embed_dim)
    b2_2d = b2.reshape(1, n_agents)

    out = pl.pallas_call(
        _avdn_mixer_kernel,
        out_shape=jax.ShapeDtypeStruct((1, padded_rows), jnp.float32),
        grid_spec=pltpu.PrefetchScalarGridSpec(
            num_scalar_prefetch=0,
            grid=(num_tiles,),
            in_specs=[
                pl.BlockSpec((tile_rows, state_dim), lambda i: (i, 0)),  # state rows
                pl.BlockSpec((tile_rows, n_agents), lambda i: (i, 0)),   # agent_qs rows
                pl.BlockSpec((state_dim, embed_dim), lambda i: (0, 0)),  # W1 (resident)
                pl.BlockSpec((1, embed_dim), lambda i: (0, 0)),          # b1 (resident)
                pl.BlockSpec((embed_dim, n_agents), lambda i: (0, 0)),   # W2 (resident)
                pl.BlockSpec((1, n_agents), lambda i: (0, 0)),           # b2 (resident)
            ],
            out_specs=pl.BlockSpec((1, tile_rows), lambda i: (0, i)),    # lane-dense
        ),
        compiler_params=pltpu.CompilerParams(
            dimension_semantics=("parallel",),
        ),
    )(st_flat, qs_flat, w1, b1_2d, w2, b2_2d)

    return out.reshape(padded_rows)[:rows].reshape(bs, seq, 1)


def reference_avdn_mixer(agent_qs, batch_state, w1, b1, w2, b2):
    h = jnp.maximum(batch_state @ w1 + b1, 0.0)
    logits = h @ w2 + b2
    w = jax.nn.softmax(logits, axis=-1)
    return jnp.sum(w * agent_qs * 5.0, axis=2, keepdims=True)


if __name__ == "__main__":
    # Small, module-consistent shapes:
    #   n_agents=4, mixing_embed_dim=32, state_shape -> state_dim=64, bs=2, seq=8
    bs, seq = 2, 8
    n_agents = 4
    embed_dim = 32
    state_dim = 64

    key = jax.random.PRNGKey(0)
    k_qs, k_st, k_w1, k_b1, k_w2, k_b2 = jax.random.split(key, 6)

    agent_qs = jax.random.normal(k_qs, (bs, seq, n_agents), dtype=jnp.float32)
    batch_state = jax.random.normal(k_st, (bs, seq, state_dim), dtype=jnp.float32)

    # Deterministic synthetic parameters (nn.Linear shapes, stored as (in, out)).
    w1 = jax.random.normal(k_w1, (state_dim, embed_dim), dtype=jnp.float32) * 0.1
    b1 = jax.random.normal(k_b1, (embed_dim,), dtype=jnp.float32) * 0.1
    w2 = jax.random.normal(k_w2, (embed_dim, n_agents), dtype=jnp.float32) * 0.1
    b2 = jax.random.normal(k_b2, (n_agents,), dtype=jnp.float32) * 0.1

    out = avdn_mixer(agent_qs, batch_state, w1, b1, w2, b2)
    out = jax.block_until_ready(out)

    ref = reference_avdn_mixer(agent_qs, batch_state, w1, b1, w2, b2)
    assert out.shape == (bs, seq, 1)
    assert jnp.allclose(out, ref, atol=1e-5, rtol=1e-5), "mismatch vs JAX reference"

    print("KERNEL_OK")
</pallas_src>

<mosaic_0001>
module attributes {stable_mosaic.version = 11 : i64} {
  func.func @_avdn_mixer_kernel(%arg0: i32, %arg1: memref<128x64xf32, #tpu.memory_space<vmem>>, %arg2: memref<128x4xf32, #tpu.memory_space<vmem>>, %arg3: memref<64x32xf32, #tpu.memory_space<vmem>>, %arg4: memref<1x32xf32, #tpu.memory_space<vmem>>, %arg5: memref<32x4xf32, #tpu.memory_space<vmem>>, %arg6: memref<1x4xf32, #tpu.memory_space<vmem>>, %arg7: memref<1x128xf32, #tpu.memory_space<vmem>>) attributes {dimension_semantics = [#tpu.dimension_semantics<parallel>], iteration_bounds = array<i64: 1>, scalar_prefetch = 0 : i64, scratch_operands = 0 : i64, tpu.core_type = #tpu.core_type<tc>, window_params = [{transform_indices = @transform_0, window_bounds = array<i64: 128, 64>}, {transform_indices = @transform_1, window_bounds = array<i64: 128, 4>}, {pipeline_mode = #tpu.pipeline_mode<synchronous>, transform_indices = @transform_2, window_bounds = array<i64: 64, 32>}, {pipeline_mode = #tpu.pipeline_mode<synchronous>, transform_indices = @transform_3, window_bounds = array<i64: 1, 32>}, {pipeline_mode = #tpu.pipeline_mode<synchronous>, transform_indices = @transform_4, window_bounds = array<i64: 32, 4>}, {pipeline_mode = #tpu.pipeline_mode<synchronous>, transform_indices = @transform_5, window_bounds = array<i64: 1, 4>}, {transform_indices = @transform_6, window_bounds = array<i64: 1, 128>}]} {
    %c0 = arith.constant 0 : index
    %c0_0 = arith.constant 0 : index
    %0 = vector.load %arg1[%c0, %c0_0] : memref<128x64xf32, #tpu.memory_space<vmem>>, vector<128x64xf32>
    %c0_1 = arith.constant 0 : index
    %c0_2 = arith.constant 0 : index
    %1 = vector.load %arg3[%c0_1, %c0_2] : memref<64x32xf32, #tpu.memory_space<vmem>>, vector<64x32xf32>
    %cst = arith.constant dense<0.000000e+00> : vector<128x32xf32>
    %2 = tpu.matmul %0, %1, %cst {dimension_numbers = #tpu.dot_dimension_numbers<[1], [0], [0], [1], [0, 0, 1, 1], [], []>} : vector<128x64xf32>, vector<64x32xf32>, vector<128x32xf32> -> vector<128x32xf32>
    %c0_3 = arith.constant 0 : index
    %c0_4 = arith.constant 0 : index
    %3 = vector.load %arg4[%c0_3, %c0_4] : memref<1x32xf32, #tpu.memory_space<vmem>>, vector<1x32xf32>
    %4 = vector.broadcast %3 : vector<1x32xf32> to vector<128x32xf32>
    %5 = arith.addf %2, %4 : vector<128x32xf32>
    %cst_5 = arith.constant 0.000000e+00 : f32
    %6 = vector.broadcast %cst_5 : f32 to vector<128x32xf32>
    %7 = arith.maximumf %5, %6 : vector<128x32xf32>
    %c0_6 = arith.constant 0 : index
    %c0_7 = arith.constant 0 : index
    %8 = vector.load %arg5[%c0_6, %c0_7] : memref<32x4xf32, #tpu.memory_space<vmem>>, vector<32x4xf32>
    %cst_8 = arith.constant dense<0.000000e+00> : vector<128x4xf32>
    %9 = tpu.matmul %7, %8, %cst_8 {dimension_numbers = #tpu.dot_dimension_numbers<[1], [0], [0], [1], [0, 0, 1, 1], [], []>} : vector<128x32xf32>, vector<32x4xf32>, vector<128x4xf32> -> vector<128x4xf32>
    %c0_9 = arith.constant 0 : index
    %c0_10 = arith.constant 0 : index
    %10 = vector.load %arg6[%c0_9, %c0_10] : memref<1x4xf32, #tpu.memory_space<vmem>>, vector<1x4xf32>
    %11 = vector.broadcast %10 : vector<1x4xf32> to vector<128x4xf32>
    %12 = arith.addf %9, %11 : vector<128x4xf32>
    %cst_11 = arith.constant dense<0xFF800000> : vector<128xf32>
    %13 = vector.multi_reduction <maximumf>, %12, %cst_11 [1] : vector<128x4xf32> to vector<128xf32>
    %14 = vector.shape_cast %13 : vector<128xf32> to vector<128x1xf32>
    %15 = vector.broadcast %14 : vector<128x1xf32> to vector<128x4xf32>
    %16 = arith.subf %12, %15 : vector<128x4xf32>
    %17 = math.exp %16 : vector<128x4xf32>
    %c0_12 = arith.constant 0 : index
    %c0_13 = arith.constant 0 : index
    %18 = vector.load %arg2[%c0_12, %c0_13] : memref<128x4xf32, #tpu.memory_space<vmem>>, vector<128x4xf32>
    %19 = arith.mulf %17, %18 : vector<128x4xf32>
    %cst_14 = arith.constant dense<0.000000e+00> : vector<128xf32>
    %20 = vector.multi_reduction <add>, %19, %cst_14 [1] : vector<128x4xf32> to vector<128xf32>
    %cst_15 = arith.constant dense<0.000000e+00> : vector<128xf32>
    %21 = vector.multi_reduction <add>, %17, %cst_15 [1] : vector<128x4xf32> to vector<128xf32>
    %cst_16 = arith.constant 5.000000e+00 : f32
    %22 = vector.broadcast %cst_16 : f32 to vector<128xf32>
    %23 = arith.mulf %22, %20 : vector<128xf32>
    %24 = arith.divf %23, %21 : vector<128xf32>
    %25 = vector.shape_cast %24 : vector<128xf32> to vector<1x128xf32>
    %c0_17 = arith.constant 0 : index
    %c0_18 = arith.constant 0 : index
    %26 = vector.load %arg7[%c0_17, %c0_18] : memref<1x128xf32, #tpu.memory_space<vmem>>, vector<1x128xf32>
    tpu.vector_store %arg7[%c0_17, %c0_18], %25 {strides = array<i32>} : memref<1x128xf32, #tpu.memory_space<vmem>>, vector<1x128xf32>,
    return
  }
  func.func @transform_0(%arg0: i32) -> (i32, i32) {
    %c0_i32 = arith.constant 0 : i32
    %c0_i32_0 = arith.constant 0 : i32
    return %arg0, %c0_i32 : i32, i32
  }
  func.func @transform_1(%arg0: i32) -> (i32, i32) {
    %c0_i32 = arith.constant 0 : i32
    %c0_i32_0 = arith.constant 0 : i32
    return %arg0, %c0_i32 : i32, i32
  }
  func.func @transform_2(%arg0: i32) -> (i32, i32) {
    %c0_i32 = arith.constant 0 : i32
    %c0_i32_0 = arith.constant 0 : i32
    %c0_i32_1 = arith.constant 0 : i32
    return %c0_i32, %c0_i32_0 : i32, i32
  }
  func.func @transform_3(%arg0: i32) -> (i32, i32) {
    %c0_i32 = arith.constant 0 : i32
    %c0_i32_0 = arith.constant 0 : i32
    %c0_i32_1 = arith.constant 0 : i32
    return %c0_i32, %c0_i32_0 : i32, i32
  }
  func.func @transform_4(%arg0: i32) -> (i32, i32) {
    %c0_i32 = arith.constant 0 : i32
    %c0_i32_0 = arith.constant 0 : i32
    %c0_i32_1 = arith.constant 0 : i32
    return %c0_i32, %c0_i32_0 : i32, i32
  }
  func.func @transform_5(%arg0: i32) -> (i32, i32) {
    %c0_i32 = arith.constant 0 : i32
    %c0_i32_0 = arith.constant 0 : i32
    %c0_i32_1 = arith.constant 0 : i32
    return %c0_i32, %c0_i32_0 : i32, i32
  }
  func.func @transform_6(%arg0: i32) -> (i32, i32) {
    %c0_i32 = arith.constant 0 : i32
    %c0_i32_0 = arith.constant 0 : i32
    return %c0_i32, %arg0 : i32, i32
  }
}

</mosaic_0001>

<bundles_post_ra>
// kernel: tpu_custom_call.1
= control target key start
LH: loop header
LB: loop body
LE: loop exit
PB: predicated region body
PF: predicated region fallthrough
CT: control target
= control target key end

     0   :  { %s1766_s0 = inlined_call_operand.vmem [shape: f32[128,64], index: 0, kind: input, shape index: {}]   ;;  %s1767_s1 = inlined_call_operand.vmem [shape: f32[128,4], index: 1, kind: input, shape index: {}]   ;;  %s1768_s2 = inlined_call_operand.vmem [shape: f32[64,32], index: 2, kind: input, shape index: {}]   ;;  %s1769_s3 = inlined_call_operand.vmem [shape: f32[1,32], index: 3, kind: input, shape index: {}]   ;;  %s1770_s4 = inlined_call_operand.vmem [shape: f32[32,4], index: 4, kind: input, shape index: {}]   ;;  %s1771_s5 = inlined_call_operand.vmem [shape: f32[1,4], index: 5, kind: input, shape index: {}]   ;;  %s1772_s6 = inlined_call_operand.hbm [shape: f32[1,128], index: 6, kind: output, shape index: {}]  }
   0x1   :  { %v47_v0 = vld [vmem:[%s1768_s2 + $0x38] sm:$0xff]  ;;  %v46_v1 = vld [vmem:[%s1768_s2 + $0x30] sm:$0xff]  ;;  %v45_v2 = vld [vmem:[%s1768_s2 + $0x28] sm:$0xff] }
   0x2   :  { %109 = vmatpush.msra.mxu0 %v47_v0  ;;  %914 = vmatpush.msra.mxu2 %v47_v0  ;;  %v44_v3 = vld [vmem:[%s1768_s2 + $0x20] sm:$0xff] }
   0x4   :  { %110 = vmatpush.msra.mxu0 %v46_v1  ;;  %915 = vmatpush.msra.mxu2 %v46_v1 }
   0x6   :  { %111 = vmatpush.msra.mxu0 %v45_v2  ;;  %916 = vmatpush.msra.mxu2 %v45_v2 }
   0x7   :  { %11 = vsyncpa [#allocation3], 0  ;;  %v43_v4 = vld [vmem:[%s1768_s2 + $0x18] sm:$0xff]  ;;  %v42_v5 = vld [vmem:[%s1768_s2 + $0x10] sm:$0xff]  ;;  %vm52_vm0 = vcmask 523264   ;;  %vm190_vm1 = vcmask 261120  }
   0x8   :  { %112 = vmatpush.msra.mxu0 %v44_v3  ;;  %917 = vmatpush.msra.mxu2 %v44_v3  ;;  %v41_v6 = vld [vmem:[%s1768_s2 + $0x8] sm:$0xff]  ;;  %v40_v7 = vld [vmem:[%s1768_s2] sm:$0xff]  ;;  %v26_v12 = vld [vmem:[%s1766_s0 + $0x10] sm:$0xff]  ;;  %vm304_vm2 = vcmask 31744   ;;  %s873_s9 = sshll.u32 %s1772_s6, 4  ;;  %s874_s9 = int_to_ptr.hbm [resolvable:$true] %s873_s9 }
   0x9   :  { %v24_v8 = vld [vmem:[%s1766_s0] sm:$0xff]  ;;  %v25_v10 = vld [vmem:[%s1766_s0 + $0x8] sm:$0xff]  ;;  %v34_v13 = vld [vmem:[%s1766_s0 + $0x50] sm:$0xff] }
   0xa   :  { %113 = vmatpush.msra.mxu0 %v43_v4  ;;  %918 = vmatpush.msra.mxu2 %v43_v4  ;;  %v32_v9 = vld [vmem:[%s1766_s0 + $0x40] sm:$0xff]  ;;  %v33_v11 = vld [vmem:[%s1766_s0 + $0x48] sm:$0xff]  ;;  %v27_v14 = vld [vmem:[%s1766_s0 + $0x18] sm:$0xff] }
   0xb   :  { %v35_v15 = vld [vmem:[%s1766_s0 + $0x58] sm:$0xff]  ;;  %v28_v17 = vld [vmem:[%s1766_s0 + $0x20] sm:$0xff]  ;;  %v29_v19 = vld [vmem:[%s1766_s0 + $0x28] sm:$0xff] }
   0xc   :  { %114 = vmatpush.msra.mxu0 %v42_v5  ;;  %919 = vmatpush.msra.mxu2 %v42_v5  ;;  %v185_v16 = vld [vmem:[%s1770_s4 + $0x18] sm:$0xff]  ;;  %v36_v18 = vld [vmem:[%s1766_s0 + $0x60] sm:$0xff]  ;;  %v37_v20 = vld [vmem:[%s1766_s0 + $0x68] sm:$0xff] }
   0xd   :  { %251 = vmatpush.msra.mxu1 %v185_v16  ;;  %922 = vmatpush.msra.mxu3 %v185_v16  ;;  %v30_v21 = vld [vmem:[%s1766_s0 + $0x30] sm:$0xff]  ;;  %v31_v23 = vld [vmem:[%s1766_s0 + $0x38] sm:$0xff]  ;;  %v183_v26 = vld [vmem:[%s1770_s4 + $0x8] sm:$0xff] }
   0xe   :  { %115 = vmatpush.msra.mxu0 %v41_v6  ;;  %920 = vmatpush.msra.mxu2 %v41_v6  ;;  %v38_v22 = vld [vmem:[%s1766_s0 + $0x70] sm:$0xff]  ;;  %v39_v24 = vld [vmem:[%s1766_s0 + $0x78] sm:$0xff]  ;;  %v182_v27 = vld [vmem:[%s1770_s4] sm:$0xff] }
   0xf   :  { %v184_v25 = vld [vmem:[%s1770_s4 + $0x10] sm:$0xff]  ;;  %v927_v28 = vld [vmem:[%s1769_s3] ss:$0 sm:$0xff] }
  0x10   :  { %116 = vmatpush.msra.mxu0 %v40_v7  ;;  %921 = vmatpush.msra.mxu2 %v40_v7 }
  0x11   :  { %882 = vmatmul.msk.f32.vlgmr.msra.gmra.mxu0 %vm52_vm0, %v24_v8  ;;  %890 = vmatmul.msk.f32.vlgmr.msra.gmra.mxu2 %vm52_vm0, %v32_v9 }
  0x12   :  { %252 = vmatpush.msra.mxu1 %v184_v25  ;;  %923 = vmatpush.msra.mxu3 %v184_v25 }
  0x14   :  { %253 = vmatpush.msra.mxu1 %v183_v26  ;;  %924 = vmatpush.msra.mxu3 %v183_v26 }
  0x16   :  { %254 = vmatpush.msra.mxu1 %v182_v27  ;;  %925 = vmatpush.msra.mxu3 %v182_v27 }
  0x19   :  { %883 = vmatmul.msk.f32.gmra.mxu0 %vm52_vm0, %v25_v10  ;;  %891 = vmatmul.msk.f32.gmra.mxu2 %vm52_vm0, %v33_v11 }
  0x21   :  { %884 = vmatmul.msk.f32.gmra.mxu0 %vm52_vm0, %v26_v12  ;;  %892 = vmatmul.msk.f32.gmra.mxu2 %vm52_vm0, %v34_v13  ;;  %v928_v13 = vld [vmem:[%s1771_s5] ss:$0 sm:$0xff] }
  0x29   :  { %885 = vmatmul.msk.f32.gmra.mxu0 %vm52_vm0, %v27_v14  ;;  %893 = vmatmul.msk.f32.gmra.mxu2 %vm52_vm0, %v35_v15 }
  0x31   :  { %886 = vmatmul.msk.f32.gmra.mxu0 %vm52_vm0, %v28_v17  ;;  %894 = vmatmul.msk.f32.gmra.mxu2 %vm52_vm0, %v36_v18 }
  0x39   :  { %887 = vmatmul.msk.f32.gmra.mxu0 %vm52_vm0, %v29_v19  ;;  %895 = vmatmul.msk.f32.gmra.mxu2 %vm52_vm0, %v37_v20 }
  0x41   :  { %888 = vmatmul.msk.f32.gmra.mxu0 %vm52_vm0, %v30_v21  ;;  %896 = vmatmul.msk.f32.gmra.mxu2 %vm52_vm0, %v38_v22 }
  0x49   :  { %889 = vmatmul.msk.f32.gmra.mxu0 %vm52_vm0, %v31_v23  ;;  %897 = vmatmul.msk.f32.gmra.mxu2 %vm52_vm0, %v39_v24 }
  0x8e   :  { %v118_v29 = vpop.f32.mrf.mxu0 }
  0x8f   :  { %v119_v30 = vadd.f32 %v927_v28, %v118_v29 }
  0x91   :  { %v166_v31 = vmax.f32 %v119_v30, 0.0 }
  0x93   :  { %898 = vmatmul.msk.f32.vlgmr.msra.gmra.mxu1 %vm190_vm1, %v166_v31 }
  0x94   :  { %v142_v32 = vpop.f32.mrf.mxu2 }
  0x95   :  { %v143_v9 = vadd.f32 %v927_v28, %v142_v32 }
  0x96   :  { %v121_v33 = vpop.f32.mrf.mxu0 }
  0x97   :  { %v122_v34 = vadd.f32 %v927_v28, %v121_v33  ;;  %v174_v12 = vmax.f32 %v143_v9, 0.0 }
  0x99   :  { %v167_v35 = vmax.f32 %v122_v34, 0.0 }
  0x9b   :  { %899 = vmatmul.msk.f32.gmra.mxu1 %vm190_vm1, %v167_v35 }
  0x9c   :  { %v145_v36 = vpop.f32.mrf.mxu2 }
  0x9d   :  { %v146_v37 = vadd.f32 %v927_v28, %v145_v36 }
  0x9e   :  { %v124_v38 = vpop.f32.mrf.mxu0 }
  0x9f   :  { %v175_v39 = vmax.f32 %v146_v37, 0.0  ;;  %v125_v40 = vadd.f32 %v927_v28, %v124_v38 }
  0xa1   :  { %v168_v41 = vmax.f32 %v125_v40, 0.0  ;;  %907 = vmatmul.msk.f32.vlgmr.msra.gmra.mxu3 %vm190_vm1, %v175_v39 }
  0xa3   :  { %900 = vmatmul.msk.f32.gmra.mxu1 %vm190_vm1, %v168_v41 }
  0xa4   :  { %v148_v42 = vpop.f32.mrf.mxu2 }
  0xa5   :  { %v149_v43 = vadd.f32 %v927_v28, %v148_v42 }
  0xa6   :  { %v127_v44 = vpop.f32.mrf.mxu0 }
  0xa7   :  { %v176_v45 = vmax.f32 %v149_v43, 0.0  ;;  %v128_v46 = vadd.f32 %v927_v28, %v127_v44 }
  0xa9   :  { %v169_v47 = vmax.f32 %v128_v46, 0.0  ;;  %908 = vmatmul.msk.f32.gmra.mxu3 %vm190_vm1, %v176_v45 }
  0xab   :  { %901 = vmatmul.msk.f32.gmra.mxu1 %vm190_vm1, %v169_v47 }
  0xac   :  { %v151_v48 = vpop.f32.mrf.mxu2 }
  0xad   :  { %v152_v49 = vadd.f32 %v927_v28, %v151_v48 }
  0xae   :  { %v130_v50 = vpop.f32.mrf.mxu0 }
  0xaf   :  { %v177_v51 = vmax.f32 %v152_v49, 0.0  ;;  %v131_v52 = vadd.f32 %v927_v28, %v130_v50 }
  0xb1   :  { %v170_v53 = vmax.f32 %v131_v52, 0.0  ;;  %909 = vmatmul.msk.f32.gmra.mxu3 %vm190_vm1, %v177_v51 }
  0xb3   :  { %902 = vmatmul.msk.f32.gmra.mxu1 %vm190_vm1, %v170_v53 }
  0xb4   :  { %v154_v54 = vpop.f32.mrf.mxu2 }
  0xb5   :  { %v155_v55 = vadd.f32 %v927_v28, %v154_v54 }
  0xb6   :  { %v133_v56 = vpop.f32.mrf.mxu0 }
  0xb7   :  { %v178_v57 = vmax.f32 %v155_v55, 0.0  ;;  %v134_v58 = vadd.f32 %v927_v28, %v133_v56 }
  0xb9   :  { %v171_v59 = vmax.f32 %v134_v58, 0.0  ;;  %910 = vmatmul.msk.f32.gmra.mxu3 %vm190_vm1, %v178_v57 }
  0xbb   :  { %903 = vmatmul.msk.f32.gmra.mxu1 %vm190_vm1, %v171_v59 }
  0xbc   :  { %v157_v60 = vpop.f32.mrf.mxu2 }
  0xbd   :  { %v158_v61 = vadd.f32 %v927_v28, %v157_v60 }
  0xbe   :  { %v136_v62 = vpop.f32.mrf.mxu0 }
  0xbf   :  { %v179_v63 = vmax.f32 %v158_v61, 0.0  ;;  %v137_v0 = vadd.f32 %v927_v28, %v136_v62 }
  0xc1   :  { %v172_v1 = vmax.f32 %v137_v0, 0.0  ;;  %911 = vmatmul.msk.f32.gmra.mxu3 %vm190_vm1, %v179_v63 }
  0xc3   :  { %904 = vmatmul.msk.f32.gmra.mxu1 %vm190_vm1, %v172_v1 }
  0xc4   :  { %v160_v2 = vpop.f32.mrf.mxu2 }
  0xc5   :  { %v161_v3 = vadd.f32 %v927_v28, %v160_v2 }
  0xc6   :  { %v139_v4 = vpop.f32.mrf.mxu0 }
  0xc7   :  { %v180_v5 = vmax.f32 %v161_v3, 0.0  ;;  %v140_v6 = vadd.f32 %v927_v28, %v139_v4  ;;  %v401_v3 = vld [vmem:[%s1767_s1] sm:$0xff] }
  0xc9   :  { %v173_v7 = vmax.f32 %v140_v6, 0.0  ;;  %912 = vmatmul.msk.f32.gmra.mxu3 %vm190_vm1, %v180_v5 }
  0xcb   :  { %905 = vmatmul.msk.f32.gmra.mxu1 %vm190_vm1, %v173_v7 }
  0xcc   :  { %v163_v8 = vpop.f32.mrf.mxu2 }
  0xcd   :  { %v164_v10 = vadd.f32 %v927_v28, %v163_v8 }
  0xcf   :  { %v181_v11 = vmax.f32 %v164_v10, 0.0 }
  0xd1   :  { %913 = vmatmul.msk.f32.gmra.mxu3 %vm190_vm1, %v181_v11  ;;  %v402_v11 = vld [vmem:[%s1767_s1 + $0x8] sm:$0xff] }
  0xd3   :  { %906 = vmatmul.msk.f32.gmra.mxu1 %vm190_vm1, %v174_v12  ;;  %vm806_vm1 = vcmask 130112  }
 0x110   :  { %v256_v14 = vpop.f32.mrf.mxu1 }
 0x111   :  { %v1177_v15 = vadd.f32 %v928_v13, %v256_v14 }
 0x113   :  { %v305_v16 = vsel %vm304_vm2, %v1177_v15, -inf }
 0x114   :  { %306 = vmax.xlane.f32.xlu0 %v305_v16 }
 0x118   :  { %v259_v17 = vpop.f32.mrf.mxu1 }
 0x119   :  { %v1181_v18 = vadd.f32 %v928_v13, %v259_v17 }
 0x11b   :  { %v308_v19 = vsel %vm304_vm2, %v1181_v18, -inf }
 0x11c   :  { %309 = vmax.xlane.f32.xlu0 %v308_v19 }
 0x120   :  { %v262_v20 = vpop.f32.mrf.mxu1 }
 0x121   :  { %v1185_v21 = vadd.f32 %v928_v13, %v262_v20 }
 0x123   :  { %v311_v22 = vsel %vm304_vm2, %v1185_v21, -inf }
 0x124   :  { %v283_v23 = vpop.f32.mrf.mxu3  ;;  %312 = vmax.xlane.f32.xlu1 %v311_v22  ;;  %v403_v22 = vld [vmem:[%s1767_s1 + $0x10] sm:$0xff] }
 0x125   :  { %v1189_v24 = vadd.f32 %v928_v13, %v283_v23 }
 0x127   :  { %v332_v25 = vsel %vm304_vm2, %v1189_v24, -inf }
 0x128   :  { %v265_v26 = vpop.f32.mrf.mxu1  ;;  %333 = vmax.xlane.f32.xlu0 %v332_v25 }
 0x129   :  { %v1193_v27 = vadd.f32 %v928_v13, %v265_v26 }
 0x12b   :  { %v314_v28 = vsel %vm304_vm2, %v1193_v27, -inf }
 0x12c   :  { %v286_v29 = vpop.f32.mrf.mxu3  ;;  %315 = vmax.xlane.f32.xlu1 %v314_v28 }
 0x12d   :  { %v1197_v30 = vadd.f32 %v928_v13, %v286_v29 }
 0x12f   :  { %v335_v34 = vsel %vm304_vm2, %v1197_v30, -inf }
 0x130   :  { %v268_v31 = vpop.f32.mrf.mxu1 }
 0x131   :  { %v1199_v32 = vadd.f32 %v928_v13, %v268_v31 }
 0x133   :  { %v317_v33 = vsel %vm304_vm2, %v1199_v32, -inf }
 0x134   :  { %v289_v35 = vpop.f32.mrf.mxu3  ;;  %318 = vmax.xlane.f32.xlu2 %v317_v33  ;;  %336 = vmax.xlane.f32.xlu1 %v335_v34 }
 0x135   :  { %v1205_v36 = vadd.f32 %v928_v13, %v289_v35  ;;  %v404_v35 = vld [vmem:[%s1767_s1 + $0x18] sm:$0xff] }
 0x137   :  { %v338_v38 = vsel %vm304_vm2, %v1205_v36, -inf }
 0x138   :  { %v271_v37 = vpop.f32.mrf.mxu1 }
 0x139   :  { %v1211_v41 = vadd.f32 %v928_v13, %v271_v37  ;;  %v410_v37 = vld [vmem:[%s1767_s1 + $0x48] sm:$0xff] }
 0x13b   :  { %v320_v45 = vsel %vm304_vm2, %v1211_v41, -inf }
 0x13c   :  { %v292_v39 = vpop.f32.mrf.mxu3  ;;  %339 = vmax.xlane.f32.xlu2 %v338_v38 }
 0x13d   :  { %v1209_v40 = vadd.f32 %v928_v13, %v292_v39 }
 0x13f   :  { %v341_v42 = vsel %vm304_vm2, %v1209_v40, -inf }
 0x140   :  { %v274_v43 = vpop.f32.mrf.mxu1  ;;  %342 = vmax.xlane.f32.xlu0 %v341_v42 }
 0x141   :  { %v1215_v44 = vadd.f32 %v928_v13, %v274_v43 }
 0x143   :  { %v323_v48 = vsel %vm304_vm2, %v1215_v44, -inf }
 0x144   :  { %v295_v46 = vpop.f32.mrf.mxu3  ;;  %321 = vmax.xlane.f32.xlu2 %v320_v45 }
 0x145   :  { %v1219_v47 = vadd.f32 %v928_v13, %v295_v46 }
 0x147   :  { %v344_v49 = vsel %vm304_vm2, %v1219_v47, -inf }
 0x148   :  { %v277_v50 = vpop.f32.mrf.mxu1  ;;  %345 = vmax.xlane.f32.xlu1 %v344_v49  ;;  %324 = vmax.xlane.f32.xlu0 %v323_v48 }
 0x149   :  { %v1225_v51 = vadd.f32 %v928_v13, %v277_v50 }
 0x14b   :  { %v326_v54 = vsel %vm304_vm2, %v1225_v51, -inf }
 0x14c   :  { %v298_v52 = vpop.f32.mrf.mxu3 }
 0x14d   :  { %v1227_v53 = vadd.f32 %v928_v13, %v298_v52 }
 0x14f   :  { %v347_v55 = vsel %vm304_vm2, %v1227_v53, -inf }
 0x150   :  { %v280_v56 = vpop.f32.mrf.mxu1  ;;  %348 = vmax.xlane.f32.xlu2 %v347_v55  ;;  %327 = vmax.xlane.f32.xlu1 %v326_v54 }
 0x151   :  { %v1233_v57 = vadd.f32 %v928_v13, %v280_v56 }
 0x153   :  { %v329_v60 = vsel %vm304_vm2, %v1233_v57, -inf }
 0x154   :  { %v301_v58 = vpop.f32.mrf.mxu3 }
 0x155   :  { %v1235_v59 = vadd.f32 %v928_v13, %v301_v58 }
 0x157   :  { %v350_v61 = vsel %vm304_vm2, %v1235_v59, -inf }
 0x158   :  { %330 = vmax.xlane.f32.xlu2 %v329_v60  ;;  %351 = vmax.xlane.f32.xlu0 %v350_v61 }
 0x187   :  { %v307_v62 = vpop.xlane.xlu0 %306 }
 0x188   :  { %v353_v63 = vsub.f32 %v1177_v15, %v307_v62 }
 0x18a   :  { %v369_v0 = vmul.f32 1.442695, %v353_v63 }
 0x18c   :  { %929 = vpow2.f32 %v369_v0 }
 0x18f   :  { %v310_v1 = vpop.xlane.xlu0 %309 }
 0x190   :  { %v354_v2 = vsub.f32 %v1181_v18, %v310_v1 }
 0x192   :  { %v930_v4 = vpop.eup %929  ;;  %v371_v5 = vmul.f32 1.442695, %v354_v2 }
 0x193   :  { %v481_v6 = vsel %vm304_vm2, %v930_v4, 0.0  ;;  %v417_v7 = vmul.f32 %v930_v4, %v401_v3 }
 0x194   :  { %931 = vpow2.f32 %v371_v5  ;;  %482 = vadd.xlane.f32.xlu2 %v481_v6 }
 0x195   :  { %v433_v8 = vsel %vm304_vm2, %v417_v7, 0.0 }
 0x196   :  { %434 = vadd.xlane.f32.xlu1 %v433_v8 }
 0x197   :  { %v313_v9 = vpop.xlane.xlu1 %312 }
 0x198   :  { %v355_v10 = vsub.f32 %v1185_v21, %v313_v9 }
 0x19a   :  { %v932_v12 = vpop.eup %931  ;;  %v373_v13 = vmul.f32 1.442695, %v355_v10  ;;  %v406_v10 = vld [vmem:[%s1767_s1 + $0x28] sm:$0xff] }
 0x19b   :  { %v334_v14 = vpop.xlane.xlu0 %333  ;;  %v484_v15 = vsel %vm304_vm2, %v932_v12, 0.0  ;;  %v418_v16 = vmul.f32 %v932_v12, %v402_v11 }
 0x19c   :  { %933 = vpow2.f32 %v373_v13  ;;  %v362_v17 = vsub.f32 %v1189_v24, %v334_v14  ;;  %485 = vadd.xlane.f32.xlu0 %v484_v15 }
 0x19d   :  { %v436_v18 = vsel %vm304_vm2, %v418_v16, 0.0 }
 0x19e   :  { %v387_v19 = vmul.f32 1.442695, %v362_v17  ;;  %437 = vadd.xlane.f32.xlu2 %v436_v18  ;;  %v407_v18 = vld [vmem:[%s1767_s1 + $0x30] sm:$0xff] }
 0x19f   :  { %v316_v20 = vpop.xlane.xlu1 %315 }
 0x1a0   :  { %935 = vpow2.f32 %v387_v19  ;;  %v356_v21 = vsub.f32 %v1193_v27, %v316_v20 }
 0x1a2   :  { %v934_v23 = vpop.eup %933  ;;  %v375_v25 = vmul.f32 1.442695, %v356_v21 }
 0x1a3   :  { %v487_v26 = vsel %vm304_vm2, %v934_v23, 0.0  ;;  %v419_v28 = vmul.f32 %v934_v23, %v403_v22 }
 0x1a4   :  { %937 = vpow2.f32 %v375_v25  ;;  %488 = vadd.xlane.f32.xlu1 %v487_v26 }
 0x1a5   :  { %v439_v24 = vsel %vm304_vm2, %v419_v28, 0.0 }
 0x1a6   :  { %v936_v29 = vpop.eup %935  ;;  %440 = vadd.xlane.f32.xlu0 %v439_v24 }
 0x1a7   :  { %v319_v31 = vpop.xlane.xlu2 %318  ;;  %v337_v33 = vpop.xlane.xlu1 %336  ;;  %v508_v34 = vsel %vm304_vm2, %v936_v29, 0.0  ;;  %v426_v45 = vmul.f32 %v936_v29, %v410_v37 }
 0x1a8   :  { %v363_v27 = vsub.f32 %v1197_v30, %v337_v33  ;;  %509 = vadd.xlane.f32.xlu2 %v508_v34  ;;  %v357_v39 = vsub.f32 %v1199_v32, %v319_v31 }
 0x1a9   :  { %v460_v49 = vsel %vm304_vm2, %v426_v45, 0.0  ;;  %v413_v45 = vld [vmem:[%s1767_s1 + $0x60] sm:$0xff] }
 0x1aa   :  { %v938_v38 = vpop.eup %937  ;;  %v389_v42 = vmul.f32 1.442695, %v363_v27  ;;  %v377_v48 = vmul.f32 1.442695, %v357_v39 }
 0x1ab   :  { %v420_v43 = vmul.f32 %v938_v38, %v404_v35  ;;  %v490_v60 = vsel %vm304_vm2, %v938_v38, 0.0 }
 0x1ac   :  { %939 = vpow2.f32 %v389_v42 }
 0x1ad   :  { %v442_v46 = vsel %vm304_vm2, %v420_v43, 0.0  ;;  %941 = vpow2.f32 %v377_v48 }
 0x1ae   :  { %443 = vadd.xlane.f32.xlu1 %v442_v46 }
 0x1af   :  { %v340_v30 = vpop.xlane.xlu2 %339 }
 0x1b0   :  { %v364_v50 = vsub.f32 %v1205_v36, %v340_v30  ;;  %461 = vadd.xlane.f32.xlu2 %v460_v49  ;;  %v405_v36 = vld [vmem:[%s1767_s1 + $0x20] sm:$0xff]  ;;  %v412_v30 = vld [vmem:[%s1767_s1 + $0x58] sm:$0xff] }
 0x1b2   :  { %v391_v52 = vmul.f32 1.442695, %v364_v50  ;;  %v1273_v54 = vpop.eup %939  ;;  %v408_v50 = vld [vmem:[%s1767_s1 + $0x38] sm:$0xff] }
 0x1b3   :  { %v343_v55 = vpop.xlane.xlu0 %342  ;;  %v511_v32 = vsel %vm304_vm2, %v1273_v54, 0.0  ;;  %v942_v61 = vpop.eup %941 }
 0x1b4   :  { %943 = vpow2.f32 %v391_v52  ;;  %512 = vadd.xlane.f32.xlu0 %v511_v32  ;;  %v365_v56 = vsub.f32 %v1209_v40, %v343_v55  ;;  %v421_v4 = vmul.f32 %v942_v61, %v405_v36  ;;  %v493_v6 = vsel %vm304_vm2, %v942_v61, 0.0  ;;  %v416_v32 = vld [vmem:[%s1767_s1 + $0x78] sm:$0xff] }
 0x1b6   :  { %v393_v0 = vmul.f32 1.442695, %v365_v56  ;;  %v445_v8 = vsel %vm304_vm2, %v421_v4, 0.0 }
 0x1b7   :  { %v322_v58 = vpop.xlane.xlu2 %321 }
 0x1b8   :  { %v358_v62 = vsub.f32 %v1211_v41, %v322_v58  ;;  %491 = vadd.xlane.f32.xlu2 %v490_v60  ;;  %v409_v60 = vld [vmem:[%s1767_s1 + $0x40] sm:$0xff] }
 0x1ba   :  { %v1283_v63 = vpop.eup %943  ;;  %v379_v1 = vmul.f32 1.442695, %v358_v62  ;;  %v414_v62 = vld [vmem:[%s1767_s1 + $0x68] sm:$0xff] }
 0x1bb   :  { %v346_v2 = vpop.xlane.xlu1 %345  ;;  %v325_v3 = vpop.xlane.xlu0 %324  ;;  %v514_v40 = vsel %vm304_vm2, %v1283_v63, 0.0  ;;  %v428_v52 = vmul.f32 %v1283_v63, %v412_v30 }
 0x1bc   :  { %945 = vpow2.f32 %v379_v1  ;;  %v366_v5 = vsub.f32 %v1219_v47, %v346_v2  ;;  %v359_v41 = vsub.f32 %v1215_v44, %v325_v3  ;;  %515 = vadd.xlane.f32.xlu1 %v514_v40  ;;  %494 = vadd.xlane.f32.xlu0 %v493_v6  ;;  %v415_v2 = vld [vmem:[%s1767_s1 + $0x70] sm:$0xff] }
 0x1bd   :  { %947 = vpow2.f32 %v393_v0  ;;  %v466_v56 = vsel %vm304_vm2, %v428_v52, 0.0 }
 0x1be   :  { %v381_v7 = vmul.f32 1.442695, %v359_v41  ;;  %v395_v9 = vmul.f32 1.442695, %v366_v5 }
 0x1c0   :  { %446 = vadd.xlane.f32.xlu2 %v445_v8  ;;  %949 = vpow2.f32 %v381_v7 }
 0x1c1   :  { %951 = vpow2.f32 %v395_v9 }
 0x1c2   :  { %v946_v11 = vpop.eup %945 }
 0x1c3   :  { %v349_v12 = vpop.xlane.xlu2 %348  ;;  %v328_v47 = vpop.xlane.xlu1 %327  ;;  %v496_v44 = vsel %vm304_vm2, %v946_v11, 0.0  ;;  %v422_v13 = vmul.f32 %v946_v11, %v406_v10 }
 0x1c4   :  { %v948_v14 = vpop.eup %947  ;;  %v367_v15 = vsub.f32 %v1227_v53, %v349_v12  ;;  %v360_v16 = vsub.f32 %v1225_v51, %v328_v47  ;;  %497 = vadd.xlane.f32.xlu1 %v496_v44 }
 0x1c5   :  { %v448_v17 = vsel %vm304_vm2, %v422_v13, 0.0  ;;  %v517_v21 = vsel %vm304_vm2, %v948_v14, 0.0  ;;  %v429_v48 = vmul.f32 %v948_v14, %v413_v45 }
 0x1c6   :  { %v397_v19 = vmul.f32 1.442695, %v367_v15  ;;  %449 = vadd.xlane.f32.xlu0 %v448_v17  ;;  %v950_v20 = vpop.eup %949  ;;  %v383_v22 = vmul.f32 1.442695, %v360_v16 }
 0x1c7   :  { %v423_v23 = vmul.f32 %v950_v20, %v407_v18  ;;  %v952_v25 = vpop.eup %951  ;;  %v499_v34 = vsel %vm304_vm2, %v950_v20, 0.0 }
 0x1c8   :  { %518 = vadd.xlane.f32.xlu2 %v517_v21  ;;  %953 = vpow2.f32 %v397_v19  ;;  %v520_v29 = vsel %vm304_vm2, %v952_v25, 0.0  ;;  %v430_v0 = vmul.f32 %v952_v25, %v414_v62 }
 0x1c9   :  { %v451_v51 = vsel %vm304_vm2, %v423_v23, 0.0  ;;  %955 = vpow2.f32 %v383_v22 }
 0x1ca   :  { %v472_v3 = vsel %vm304_vm2, %v430_v0, 0.0 }
 0x1cb   :  { %v331_v53 = vpop.xlane.xlu2 %330  ;;  %v352_v26 = vpop.xlane.xlu0 %351 }
 0x1cc   :  { %v361_v28 = vsub.f32 %v1233_v57, %v331_v53  ;;  %v368_v24 = vsub.f32 %v1235_v59, %v352_v26  ;;  %452 = vadd.xlane.f32.xlu1 %v451_v51  ;;  %v411_v59 = vld [vmem:[%s1767_s1 + $0x50] sm:$0xff]  ;;  %s1019_s1 = smov [#allocation2]  }
 0x1cd   :  { %v427_v43 = vmul.f32 %v1273_v54, %v411_v59  ;;  %v469_v54 = vsel %vm304_vm2, %v429_v48, 0.0  ;;  %v801_v59 = vlaneseq  ;;  %s871_s30 = sshll.u32 %s1019_s1, 4  ;;  %s872_s30 = int_to_ptr.vmem [resolvable:$true] %s871_s30 }
 0x1ce   :  { %v385_v31 = vmul.f32 1.442695, %v361_v28  ;;  %v399_v33 = vmul.f32 1.442695, %v368_v24  ;;  %521 = vadd.xlane.f32.xlu0 %v520_v29  ;;  %v954_v27 = vpop.eup %953 }
 0x1cf   :  { %v956_v35 = vpop.eup %955  ;;  %v523_v37 = vsel %vm304_vm2, %v954_v27, 0.0  ;;  %v463_v49 = vsel %vm304_vm2, %v427_v43, 0.0  ;;  %v431_v40 = vmul.f32 %v954_v27, %v415_v2  ;;  %v1363_v30 = vand.u32 127, %v801_v59 }
 0x1d0   :  { %500 = vadd.xlane.f32.xlu2 %v499_v34  ;;  %957 = vpow2.f32 %v399_v33  ;;  %v502_v57 = vsel %vm304_vm2, %v956_v35, 0.0  ;;  %v424_v55 = vmul.f32 %v956_v35, %v408_v50 }
 0x1d1   :  { %959 = vpow2.f32 %v385_v31  ;;  %v475_v4 = vsel %vm304_vm2, %v431_v40, 0.0  ;;  %v808_v40 = vadd.s32 4294967280, %v1363_v30  ;;  %v1449_v59 = vadd.s32 4294967248, %v1363_v30 }
 0x1d2   :  { %v454_v61 = vsel %vm304_vm2, %v424_v55, 0.0  ;;  %v804_v55 = vadd.s32 4294967288, %v1363_v30 }
 0x1d4   :  { %524 = vadd.xlane.f32.xlu1 %v523_v37 }
 0x1d6   :  { %503 = vadd.xlane.f32.xlu0 %v502_v57  ;;  %v958_v38 = vpop.eup %957 }
 0x1d7   :  { %v960_v39 = vpop.eup %959  ;;  %v526_v42 = vsel %vm304_vm2, %v958_v38, 0.0  ;;  %v432_v58 = vmul.f32 %v958_v38, %v416_v32 }
 0x1d8   :  { %527 = vadd.xlane.f32.xlu2 %v526_v42  ;;  %v505_v46 = vsel %vm304_vm2, %v960_v39, 0.0  ;;  %v425_v36 = vmul.f32 %v960_v39, %v409_v60 }
 0x1d9   :  { %v478_v63 = vsel %vm304_vm2, %v432_v58, 0.0 }
 0x1da   :  { %v457_v1 = vsel %vm304_vm2, %v425_v36, 0.0  ;;  %vm810_vm2 = vcmask 195712  }
 0x1dc   :  { %506 = vadd.xlane.f32.xlu1 %v505_v46 }
 0x1de   :  { %464 = vadd.xlane.f32.xlu0 %v463_v49 }
 0x1e0   :  { %470 = vadd.xlane.f32.xlu2 %v469_v54 }
 0x1e4   :  { %467 = vadd.xlane.f32.xlu1 %v466_v56 }
 0x1e6   :  { %455 = vadd.xlane.f32.xlu0 %v454_v61 }
 0x1e8   :  { %479 = vadd.xlane.f32.xlu2 %v478_v63 }
 0x1ec   :  { %458 = vadd.xlane.f32.xlu1 %v457_v1 }
 0x1ee   :  { %473 = vadd.xlane.f32.xlu0 %v472_v3 }
 0x1f4   :  { %476 = vadd.xlane.f32.xlu1 %v475_v4 }
 0x207   :  { %v483_v5 = vpop.xlane.xlu2 %482 }
 0x208   :  { %961 = vrcp.f32 %v483_v5  ;;  %v556_v10 = vand.u32 2147483648, %v483_v5  ;;  %v554_v12 = vand.u32 2147483647, %v483_v5  ;;  %vm550_vm4 = vweird.f32 %v483_v5 }
 0x209   :  { %v435_v7 = vpop.xlane.xlu1 %434 }
 0x20a   :  { %v557_v13 = vor.u32 1.1754944e-38, %v556_v10  ;;  %vm555_vm6 = vcmp.eq.f32.partialorder %v554_v12, 8.507059e+37  ;;  %v529_v15 = vmul.f32 5.0, %v435_v7  ;;  %v1396_v10 = vadd.s32 4294967224, %v1363_v30 }
 0x20b   :  { %v1401_v12 = vadd.s32 4294967272, %v1363_v30 }
 0x20e   :  { %v962_v41 = vpop.eup %961 }
 0x20f   :  { %v546_v6 = vmul.f32 %v962_v41, %v483_v5  ;;  %v486_v8 = vpop.xlane.xlu0 %485  ;;  %vm551_vm3 = vweird.f32 %v962_v41 }
 0x210   :  { %963 = vrcp.f32 %v486_v8  ;;  %vm552_vm5 = vmor %vm550_vm4, %vm551_vm3  ;;  %v571_v27 = vand.u32 2147483648, %v486_v8  ;;  %vm565_vm8 = vweird.f32 %v486_v8  ;;  %v569_v37 = vand.u32 2147483647, %v486_v8 }
 0x211   :  { %v547_v9 = vsub.f32 1.0, %v546_v6  ;;  %v438_v47 = vpop.xlane.xlu2 %437 }
 0x212   :  { %v572_v43 = vor.u32 1.1754944e-38, %v571_v27  ;;  %vm570_vm11 = vcmp.eq.f32.partialorder %v569_v37, 8.507059e+37  ;;  %v530_v50 = vmul.f32 5.0, %v438_v47 }
 0x213   :  { %v548_v11 = vmul.f32 %v962_v41, %v547_v9 }
 0x215   :  { %v549_v44 = vadd.f32 %v962_v41, %v548_v11 }
 0x216   :  { %v964_v17 = vpop.eup %963 }
 0x217   :  { %v553_v14 = vsel %vm552_vm5, %v962_v41, %v549_v44  ;;  %v489_v16 = vpop.xlane.xlu1 %488  ;;  %v561_v20 = vmul.f32 %v964_v17, %v486_v8  ;;  %vm566_vm7 = vweird.f32 %v964_v17 }
 0x218   :  { %v558_v18 = vsel %vm555_vm6, %v557_v13, %v553_v14  ;;  %965 = vrcp.f32 %v489_v16  ;;  %vm567_vm9 = vmor %vm565_vm8, %vm566_vm7  ;;  %v584_v45 = vand.u32 2147483647, %v489_v16  ;;  %v586_v46 = vand.u32 2147483648, %v489_v16 }
 0x219   :  { %v1345_v19 = vmul.f32 %v558_v18, %v529_v15  ;;  %v562_v23 = vsub.f32 1.0, %v561_v20  ;;  %v441_v53 = vpop.xlane.xlu0 %440  ;;  %vm580_vm12 = vweird.f32 %v489_v16  ;;  %v1410_v14 = vadd.s32 4294967264, %v1363_v30 }
 0x21a   :  { %vm585_vm14 = vcmp.eq.f32.partialorder %v584_v45, 8.507059e+37  ;;  %v587_v32 = vor.u32 1.1754944e-38, %v586_v46  ;;  %v531_v0 = vmul.f32 5.0, %v441_v53 }
 0x21b   :  { %v1347_v21 = vpop.xlane.xlu2 %509  ;;  %v563_v51 = vmul.f32 %v964_v17, %v562_v23  ;;  %v803_v44 = vperm.slane %v1345_v19, %v1363_v30 }
 0x21c   :  { %967 = vrcp.f32 %v1347_v21  ;;  %v691_v36 = vand.u32 2147483648, %v1347_v21  ;;  %vm685_vm0 = vweird.f32 %v1347_v21  ;;  %v689_v1 = vand.u32 2147483647, %v1347_v21 }
 0x21d   :  { %v564_v31 = vadd.f32 %v964_v17, %v563_v51  ;;  %v1426_v51 = vadd.s32 4294967256, %v1363_v30 }
 0x21e   :  { %v966_v22 = vpop.eup %965  ;;  %v692_v9 = vor.u32 1.1754944e-38, %v691_v36  ;;  %vm690_vm4 = vcmp.eq.f32.partialorder %v689_v1, 8.507059e+37 }
 0x21f   :  { %v576_v25 = vmul.f32 %v966_v22, %v489_v16  ;;  %v568_v38 = vsel %vm567_vm9, %v964_v17, %v564_v31  ;;  %vm581_vm10 = vweird.f32 %v966_v22 }
 0x220   :  { %v573_v49 = vsel %vm570_vm11, %v572_v43, %v568_v38  ;;  %vm582_vm13 = vmor %vm580_vm12, %vm581_vm10 }
 0x221   :  { %v577_v28 = vsub.f32 1.0, %v576_v25  ;;  %v444_v34 = vpop.xlane.xlu1 %443  ;;  %v574_v58 = vmul.f32 %v573_v49, %v530_v50 }
 0x222   :  { %v1350_v26 = vpop.eup %967  ;;  %v1407_v13 = vmul.f32 5.0, %v444_v34 }
 0x223   :  { %v1352_v24 = vpop.xlane.xlu2 %461  ;;  %v681_v29 = vmul.f32 %v1350_v26, %v1347_v21  ;;  %v578_v33 = vmul.f32 %v966_v22, %v577_v28  ;;  %vm686_vm15 = vweird.f32 %v1350_v26  ;;  %v805_v5 = vperm.slane %v574_v58, %v804_v55 }
 0x224   :  { %vm1386_vm3 = vmor %vm685_vm0, %vm686_vm15  ;;  %v538_v19 = vmul.f32 5.0, %v1352_v24 }
 0x225   :  { %v682_v57 = vsub.f32 1.0, %v681_v29  ;;  %v579_v39 = vadd.f32 %v966_v22, %v578_v33  ;;  %v807_v20 = vsel %vm806_vm1, %v805_v5, %v803_v44  ;;  %vm814_vm1 = vcmask 261312  }
 0x227   :  { %v1356_v35 = vpop.xlane.xlu0 %512  ;;  %v683_v48 = vmul.f32 %v1350_v26, %v682_v57  ;;  %v583_v52 = vsel %vm582_vm13, %v966_v22, %v579_v39 }
 0x228   :  { %v588_v62 = vsel %vm585_vm14, %v587_v32, %v583_v52  ;;  %v704_v24 = vand.u32 2147483647, %v1356_v35  ;;  %v706_v33 = vand.u32 2147483648, %v1356_v35  ;;  %vm700_vm5 = vweird.f32 %v1356_v35 }
 0x229   :  { %v684_v60 = vadd.f32 %v1350_v26, %v683_v48  ;;  %v589_v41 = vmul.f32 %v588_v62, %v531_v0 }
 0x22a   :  { %v707_v52 = vor.u32 1.1754944e-38, %v706_v33  ;;  %vm1472_vm12 = vcmp.eq.f32.partialorder %v704_v24, 8.507059e+37 }
 0x22b   :  { %v1358_v42 = vpop.xlane.xlu2 %491  ;;  %v688_v6 = vsel %vm1386_vm3, %v1350_v26, %v684_v60  ;;  %v809_v21 = vperm.slane %v589_v41, %v808_v40 }
 0x22c   :  { %969 = vrcp.f32 %v1358_v42  ;;  %v693_v16 = vsel %vm690_vm4, %v692_v9, %v688_v6  ;;  %v599_v22 = vand.u32 2147483647, %v1358_v42  ;;  %v601_v29 = vand.u32 2147483648, %v1358_v42 }
 0x22d   :  { %971 = vrcp.f32 %v1356_v35  ;;  %v1428_v28 = vmul.f32 %v693_v16, %v538_v19  ;;  %v1441_v37 = vsel %vm810_vm2, %v809_v21, %v807_v20  ;;  %vm595_vm7 = vweird.f32 %v1358_v42 }
 0x22e   :  { %vm1444_vm8 = vcmp.eq.f32.partialorder %v599_v22, 8.507059e+37  ;;  %v602_v58 = vor.u32 1.1754944e-38, %v601_v29  ;;  %v1549_v29 = vadd.s32 4294967216, %v1363_v30 }
 0x22f   :  { %v1365_v54 = vpop.xlane.xlu1 %515  ;;  %v1369_v56 = vpop.xlane.xlu0 %494  ;;  %v837_v55 = vperm.slane %v1428_v28, %v1396_v10 }
 0x230   :  { %973 = vrcp.f32 %v1365_v54  ;;  %v614_v45 = vand.u32 2147483647, %v1369_v56  ;;  %v616_v46 = vand.u32 2147483648, %v1369_v56  ;;  %vm715_vm13 = vweird.f32 %v1365_v54 }
 0x231   :  { %975 = vrcp.f32 %v1369_v56  ;;  %vm610_vm14 = vweird.f32 %v1369_v56  ;;  %v719_v0 = vand.u32 2147483647, %v1365_v54  ;;  %v721_v1 = vand.u32 2147483648, %v1365_v54 }
 0x232   :  { %v1374_v61 = vpop.eup %969  ;;  %vm1491_vm0 = vcmp.eq.f32.partialorder %v614_v45, 8.507059e+37  ;;  %v1567_v45 = vadd.s32 4294967200, %v1363_v30 }
 0x233   :  { %v1377_v63 = vpop.eup %971  ;;  %v591_v2 = vmul.f32 %v1374_v61, %v1358_v42  ;;  %v1383_v3 = vpop.xlane.xlu2 %446  ;;  %vm596_vm6 = vweird.f32 %v1374_v61  ;;  %vm1521_vm4 = vcmp.eq.f32.partialorder %v719_v0, 8.507059e+37 }
 0x234   :  { %v696_v11 = vmul.f32 %v1377_v63, %v1356_v35  ;;  %vm1456_vm9 = vmor %vm595_vm7, %vm596_vm6  ;;  %vm701_vm11 = vweird.f32 %v1377_v63  ;;  %v533_v16 = vmul.f32 5.0, %v1383_v3  ;;  %vm818_vm6 = vcmask 326912  }
 0x235   :  { %v592_v7 = vsub.f32 1.0, %v591_v2  ;;  %vm1517_vm3 = vmor %vm700_vm5, %vm701_vm11 }
 0x236   :  { %v1393_v8 = vpop.eup %973  ;;  %v697_v25 = vsub.f32 1.0, %v696_v11 }
 0x237   :  { %v1403_v47 = vpop.eup %975  ;;  %v1412_v15 = vpop.xlane.xlu1 %497  ;;  %v593_v17 = vmul.f32 %v1374_v61, %v592_v7  ;;  %v711_v53 = vmul.f32 %v1393_v8, %v1365_v54 }
 0x238   :  { %v606_v18 = vmul.f32 %v1403_v47, %v1369_v56  ;;  %977 = vrcp.f32 %v1412_v15  ;;  %v698_v39 = vmul.f32 %v1377_v63, %v697_v25  ;;  %vm611_vm10 = vweird.f32 %v1403_v47 }
 0x239   :  { %v1421_v23 = vpop.xlane.xlu0 %449  ;;  %v594_v34 = vadd.f32 %v1374_v61, %v593_v17  ;;  %v712_v43 = vsub.f32 1.0, %v711_v53  ;;  %vm1487_vm15 = vmor %vm610_vm14, %vm611_vm10  ;;  %v617_v56 = vor.u32 1.1754944e-38, %v616_v46  ;;  %v629_v11 = vand.u32 2147483647, %v1412_v15 }
 0x23a   :  { %v607_v26 = vsub.f32 1.0, %v606_v18  ;;  %v699_v5 = vadd.f32 %v1377_v63, %v698_v39  ;;  %vm625_vm7 = vweird.f32 %v1412_v15  ;;  %v534_v22 = vmul.f32 5.0, %v1421_v23 }
 0x23b   :  { %v1431_v31 = vpop.xlane.xlu2 %518  ;;  %v598_v32 = vsel %vm1456_vm9, %v1374_v61, %v594_v34  ;;  %v713_v61 = vmul.f32 %v1393_v8, %v712_v43  ;;  %v722_v53 = vor.u32 1.1754944e-38, %v721_v1  ;;  %vm1544_vm9 = vcmp.eq.f32.partialorder %v629_v11, 8.507059e+37 }
 0x23c   :  { %v608_v27 = vmul.f32 %v1403_v47, %v607_v26  ;;  %979 = vrcp.f32 %v1431_v31  ;;  %v603_v41 = vsel %vm1444_vm8, %v602_v58, %v598_v32  ;;  %v703_v35 = vsel %vm1517_vm3, %v1377_v63, %v699_v5 }
 0x23d   :  { %v604_v21 = vmul.f32 %v603_v41, %v1407_v13  ;;  %v714_v13 = vadd.f32 %v1393_v8, %v713_v61  ;;  %vm716_vm8 = vweird.f32 %v1393_v8  ;;  %v734_v57 = vand.u32 2147483647, %v1431_v31 }
 0x23e   :  { %v1451_v38 = vpop.eup %977  ;;  %v609_v42 = vadd.f32 %v1403_v47, %v608_v27  ;;  %v1557_v27 = vsel %vm1472_vm12, %v707_v52, %v703_v35  ;;  %vm730_vm10 = vweird.f32 %v1431_v31  ;;  %v736_v43 = vand.u32 2147483648, %v1431_v31  ;;  %vm1573_vm11 = vmor %vm715_vm13, %vm716_vm8 }
 0x23f   :  { %v621_v49 = vmul.f32 %v1451_v38, %v1412_v15  ;;  %v1464_v50 = vpop.xlane.xlu1 %452  ;;  %vm626_vm2 = vweird.f32 %v1451_v38  ;;  %v813_v39 = vperm.slane %v604_v21, %v1401_v12  ;;  %vm822_vm12 = vcmask 392512  }
 0x240   :  { %v613_v6 = vsel %vm1487_vm15, %v1403_v47, %v609_v42  ;;  %v631_v47 = vand.u32 2147483648, %v1412_v15  ;;  %vm1532_vm5 = vmor %vm625_vm7, %vm626_vm2  ;;  %v718_v42 = vsel %vm1573_vm11, %v1393_v8, %v714_v13  ;;  %v1587_v54 = vmul.f32 5.0, %v1464_v50 }
 0x241   :  { %v622_v62 = vsub.f32 1.0, %v621_v49  ;;  %v1478_v36 = vpop.xlane.xlu0 %521  ;;  %v618_v3 = vsel %vm1491_vm0, %v617_v56, %v613_v6  ;;  %v1594_v58 = vadd.s32 4294967208, %v1363_v30  ;;  %v815_v8 = vsel %vm814_vm1, %v813_v39, %v1441_v37 }
 0x242   :  { %v1482_v2 = vpop.eup %979  ;;  %981 = vrcp.f32 %v1478_v36  ;;  %v619_v24 = vmul.f32 %v618_v3, %v533_v16  ;;  %v632_v33 = vor.u32 1.1754944e-38, %v631_v47  ;;  %vm1601_vm13 = vcmp.eq.f32.partialorder %v734_v57, 8.507059e+37 }
 0x243   :  { %v623_v7 = vmul.f32 %v1451_v38, %v622_v62  ;;  %v1503_v9 = vpop.xlane.xlu2 %500  ;;  %v726_v44 = vmul.f32 %v1482_v2, %v1431_v31  ;;  %v737_v61 = vor.u32 1.1754944e-38, %v736_v43  ;;  %v1607_v40 = vsel %vm1521_vm4, %v722_v53, %v718_v42 }
 0x244   :  { %983 = vrcp.f32 %v1503_v9  ;;  %v817_v60 = vperm.slane %v619_v24, %v1410_v14  ;;  %v644_v0 = vand.u32 2147483647, %v1503_v9  ;;  %v646_v4 = vand.u32 2147483648, %v1503_v9 }
 0x245   :  { %v624_v17 = vadd.f32 %v1451_v38, %v623_v7  ;;  %v727_v63 = vsub.f32 1.0, %v726_v44  ;;  %vm731_vm14 = vweird.f32 %v1482_v2  ;;  %v1615_v37 = vadd.s32 4294967240, %v1363_v30 }
 0x246   :  { %vm640_vm15 = vweird.f32 %v1503_v9  ;;  %v819_v11 = vsel %vm818_vm6, %v817_v60, %v815_v8  ;;  %vm1623_vm0 = vcmp.eq.f32.partialorder %v644_v0, 8.507059e+37  ;;  %v647_v35 = vor.u32 1.1754944e-38, %v646_v4  ;;  %vm1639_vm2 = vmor %vm730_vm10, %vm731_vm14 }
 0x247   :  { %v1537_v25 = vpop.xlane.xlu1 %524  ;;  %v628_v15 = vsel %vm1532_vm5, %v1451_v38, %v624_v17  ;;  %v728_v49 = vmul.f32 %v1482_v2, %v727_v63  ;;  %vm745_vm4 = vweird.f32 %v1478_v36  ;;  %v749_v39 = vand.u32 2147483647, %v1478_v36 }
 0x248   :  { %v1551_v23 = vpop.eup %981  ;;  %v633_v12 = vsel %vm1544_vm9, %v632_v33, %v628_v15  ;;  %vm826_vm10 = vcmask 458112   ;;  %vm834_vm14 = vcmask 589312  }
 0x249   :  { %v1553_v34 = vpop.xlane.xlu0 %503  ;;  %v741_v52 = vmul.f32 %v1551_v23, %v1478_v36  ;;  %v634_v50 = vmul.f32 %v633_v12, %v534_v22  ;;  %v729_v6 = vadd.f32 %v1482_v2, %v728_v49  ;;  %vm746_vm3 = vweird.f32 %v1551_v23 }
 0x24a   :  { %v1560_v38 = vpop.eup %983  ;;  %985 = vrcp.f32 %v1553_v34  ;;  %v659_v47 = vand.u32 2147483647, %v1553_v34  ;;  %v661_v21 = vand.u32 2147483648, %v1553_v34  ;;  %vm655_vm7 = vweird.f32 %v1553_v34 }
 0x24b   :  { %v636_v48 = vmul.f32 %v1560_v38, %v1503_v9  ;;  %987 = vrcp.f32 %v1537_v25  ;;  %v1591_v32 = vpop.xlane.xlu2 %527  ;;  %v742_v41 = vsub.f32 1.0, %v741_v52  ;;  %v821_v18 = vperm.slane %v634_v50, %v1426_v51 }
 0x24c   :  { %989 = vrcp.f32 %v1591_v32  ;;  %vm641_vm1 = vweird.f32 %v1560_v38  ;;  %v1644_v51 = vadd.s32 4294967232, %v1363_v30  ;;  %v733_v31 = vsel %vm1639_vm2, %v1482_v2, %v729_v6 }
 0x24d   :  { %v637_v62 = vsub.f32 1.0, %v636_v48  ;;  %v743_v13 = vmul.f32 %v1551_v23, %v742_v41  ;;  %vm1658_vm6 = vmor %vm640_vm15, %vm641_vm1  ;;  %vm1663_vm8 = vcmp.eq.f32.partialorder %v659_v47, 8.507059e+37  ;;  %v1668_v57 = vsel %vm822_vm12, %v821_v18, %v819_v11 }
 0x24e   :  { %v662_v9 = vor.u32 1.1754944e-38, %v661_v21  ;;  %v738_v12 = vsel %vm1601_vm13, %v737_v61, %v733_v31  ;;  %v779_v60 = vand.u32 2147483647, %v1591_v32  ;;  %vm775_vm11 = vweird.f32 %v1591_v32 }
 0x24f   :  { %v638_v14 = vmul.f32 %v1560_v38, %v637_v62  ;;  %v1611_v56 = vpop.xlane.xlu1 %506  ;;  %v744_v62 = vadd.f32 %v1551_v23, %v743_v13  ;;  %vm830_vm12 = vcmask 523712   ;;  %vm1692_vm1 = vcmp.eq.f32.partialorder %v749_v39, 8.507059e+37 }
 0x250   :  { %v986_v5 = vpop.eup %985  ;;  %991 = vrcp.f32 %v1611_v56  ;;  %v674_v4 = vand.u32 2147483647, %v1611_v56  ;;  %v676_v41 = vand.u32 2147483648, %v1611_v56  ;;  %vm670_vm15 = vweird.f32 %v1611_v56 }
 0x251   :  { %v1620_v7 = vpop.eup %987  ;;  %v651_v16 = vmul.f32 %v986_v5, %v1553_v34  ;;  %v465_v17 = vpop.xlane.xlu0 %464  ;;  %v639_v20 = vadd.f32 %v1560_v38, %v638_v14  ;;  %vm656_vm5 = vweird.f32 %v986_v5  ;;  %vm1698_vm2 = vcmp.eq.f32.partialorder %v779_v60, 8.507059e+37 }
 0x252   :  { %v1633_v3 = vpop.eup %989  ;;  %v756_v53 = vmul.f32 %v1620_v7, %v1537_v25  ;;  %vm657_vm9 = vmor %vm655_vm7, %vm656_vm5  ;;  %v539_v50 = vmul.f32 5.0, %v465_v17  ;;  %v751_v17 = vand.u32 2147483648, %v1478_v36 }
 0x253   :  { %v652_v19 = vsub.f32 1.0, %v651_v16  ;;  %v771_v15 = vmul.f32 %v1633_v3, %v1591_v32  ;;  %v643_v2 = vsel %vm1658_vm6, %v1560_v38, %v639_v20  ;;  %v471_v52 = vpop.xlane.xlu2 %470  ;;  %v781_v38 = vand.u32 2147483648, %v1591_v32  ;;  %vm1706_vm7 = vmor %vm745_vm4, %vm746_vm3 }
 0x254   :  { %v757_v49 = vsub.f32 1.0, %v756_v53  ;;  %v648_v0 = vsel %vm1623_vm0, %v647_v35, %v643_v2  ;;  %v541_v44 = vmul.f32 5.0, %v471_v52  ;;  %vm838_vm0 = vcmask 654912  }
 0x255   :  { %v653_v63 = vmul.f32 %v986_v5, %v652_v19  ;;  %v772_v43 = vsub.f32 1.0, %v771_v15  ;;  %v709_v47 = vmul.f32 %v1557_v27, %v539_v50  ;;  %vm842_vm6 = vcmask 720512  }
 0x256   :  { %v992_v33 = vpop.eup %991  ;;  %vm776_vm5 = vweird.f32 %v1633_v3  ;;  %v677_v27 = vor.u32 1.1754944e-38, %v676_v41  ;;  %v748_v19 = vsel %vm1706_vm7, %v1551_v23, %v744_v62  ;;  %v739_v22 = vmul.f32 %v738_v12, %v541_v44 }
 0x257   :  { %v666_v46 = vmul.f32 %v992_v33, %v1611_v56  ;;  %v468_v48 = vpop.xlane.xlu1 %467  ;;  %v654_v42 = vadd.f32 %v986_v5, %v653_v63  ;;  %v773_v6 = vmul.f32 %v1633_v3, %v772_v43  ;;  %vm671_vm13 = vweird.f32 %v992_v33  ;;  %vm1725_vm3 = vmor %vm775_vm11, %vm776_vm5 }
 0x258   :  { %v540_v18 = vmul.f32 5.0, %v468_v48  ;;  %v758_v56 = vmul.f32 %v1620_v7, %v757_v49  ;;  %v752_v63 = vor.u32 1.1754944e-38, %v751_v17  ;;  %v841_v24 = vperm.slane %v709_v47, %v1549_v29 }
 0x259   :  { %v667_v8 = vsub.f32 1.0, %v666_v46  ;;  %v658_v1 = vsel %vm657_vm9, %v986_v5, %v654_v42  ;;  %v456_v61 = vpop.xlane.xlu0 %455  ;;  %v649_v5 = vmul.f32 %v648_v0, %v1587_v54  ;;  %v774_v13 = vadd.f32 %v1633_v3, %v773_v6 }
 0x25a   :  { %v663_v34 = vsel %vm1663_vm8, %v662_v9, %v658_v1  ;;  %v536_v14 = vmul.f32 5.0, %v456_v61  ;;  %vm672_vm8 = vmor %vm670_vm15, %vm671_vm13  ;;  %vm675_vm9 = vcmp.eq.f32.partialorder %v674_v4, 8.507059e+37  ;;  %v724_v2 = vmul.f32 %v1607_v40, %v540_v18 }
 0x25b   :  { %v668_v11 = vmul.f32 %v992_v33, %v667_v8  ;;  %v825_v15 = vperm.slane %v649_v5, %v1449_v59  ;;  %v782_v39 = vor.u32 1.1754944e-38, %v781_v38  ;;  %v480_v59 = vpop.xlane.xlu2 %479  ;;  %v753_v46 = vsel %vm1692_vm1, %v752_v63, %v748_v19 }
 0x25c   :  { %v664_v20 = vmul.f32 %v663_v34, %v536_v14  ;;  %v759_v29 = vadd.f32 %v1620_v7, %v758_v56  ;;  %vm761_vm4 = vweird.f32 %v1620_v7  ;;  %v849_v40 = vperm.slane %v739_v22, %v1567_v45 }
 0x25d   :  { %v669_v35 = vadd.f32 %v992_v33, %v668_v11  ;;  %v766_v12 = vand.u32 2147483648, %v1537_v25  ;;  %v827_v48 = vsel %vm826_vm10, %v825_v15, %v1668_v57  ;;  %vm760_vm11 = vweird.f32 %v1537_v25 }
 0x25e   :  { %v829_v9 = vperm.slane %v664_v20, %v1615_v37  ;;  %v778_v37 = vsel %vm1725_vm3, %v1633_v3, %v774_v13  ;;  %v764_v49 = vand.u32 2147483647, %v1537_v25  ;;  %v845_v52 = vperm.slane %v724_v2, %v1594_v58  ;;  %vm1746_vm13 = vmor %vm760_vm11, %vm761_vm4 }
 0x25f   :  { %v673_v53 = vsel %vm672_vm8, %v992_v33, %v669_v35  ;;  %v459_v36 = vpop.xlane.xlu1 %458  ;;  %v544_v60 = vmul.f32 5.0, %v480_v59  ;;  %v852_v38 = vadd.s32 4294967192, %v1363_v30  ;;  %v783_v57 = vsel %vm1698_vm2, %v782_v39, %v778_v37 }
 0x260   :  { %v678_v31 = vsel %vm675_vm9, %v677_v27, %v673_v53  ;;  %v537_v26 = vmul.f32 5.0, %v459_v36  ;;  %v831_v45 = vsel %vm830_vm12, %v829_v9, %v827_v48  ;;  %v763_v25 = vsel %vm1746_vm13, %v1620_v7, %v759_v29 }
 0x261   :  { %v474_v43 = vpop.xlane.xlu0 %473  ;;  %vm846_vm10 = vcmask 786112   ;;  %v767_v0 = vor.u32 1.1754944e-38, %v766_v12  ;;  %vm850_vm12 = vcmask 851712   ;;  %vm765_vm15 = vcmp.eq.f32.partialorder %v764_v49, 8.507059e+37 }
 0x262   :  { %v679_v33 = vmul.f32 %v678_v31, %v537_v26  ;;  %v542_v32 = vmul.f32 5.0, %v474_v43  ;;  %v856_v1 = vadd.s32 4294967184, %v1363_v30  ;;  %v860_v34 = vadd.s32 4294967176, %v1363_v30 }
 0x263   :  { %v784_v14 = vmul.f32 %v783_v57, %v544_v60  ;;  %v768_v7 = vsel %vm765_vm15, %v767_v0, %v763_v25  ;;  %vm862_vm1 = vcmask 1048512  }
 0x264   :  { %v833_v42 = vperm.slane %v679_v33, %v1644_v51  ;;  %v754_v62 = vmul.f32 %v753_v46, %v542_v32 }
 0x266   :  { %v835_v51 = vsel %vm834_vm14, %v833_v42, %v831_v45  ;;  %vm854_vm14 = vcmask 917312   ;;  %v853_v10 = vperm.slane %v754_v62, %v852_v38 }
 0x267   :  { %v839_v58 = vsel %vm838_vm0, %v837_v55, %v835_v51  ;;  %v477_v8 = vpop.xlane.xlu1 %476  ;;  %vm858_vm0 = vcmask 982912   ;;  %v861_v55 = vperm.slane %v784_v14, %v860_v34 }
 0x268   :  { %v843_v50 = vsel %vm842_vm6, %v841_v24, %v839_v58  ;;  %v543_v61 = vmul.f32 5.0, %v477_v8 }
 0x269   :  { %v847_v4 = vsel %vm846_vm10, %v845_v52, %v843_v50 }
 0x26a   :  { %v769_v41 = vmul.f32 %v768_v7, %v543_v61  ;;  %v851_v6 = vsel %vm850_vm12, %v849_v40, %v847_v4 }
 0x26b   :  { %v855_v11 = vsel %vm854_vm14, %v853_v10, %v851_v6 }
 0x26c   :  { %v857_v28 = vperm.slane %v769_v41, %v856_v1 }
 0x26e   :  { %v859_v44 = vsel %vm858_vm0, %v857_v28, %v855_v11 }
 0x26f   :  { %v863_v30 = vsel %vm862_vm1, %v861_v55, %v859_v44 }
 0x270   :  { %865 = vst [vmem:[#allocation2] sm:$0x1] %v863_v30 }
 0x271   :  { %876 = dma.vmem_to_hbm [thread:$0]  %s872_s30, 16, %s874_s9, [#allocation3]  }
 0x272   :  { %1017 = dma.done.wait [#allocation3], 16  }
 0x273   :  { %1018 = vsyncadd [#allocation3], 4294967280 }
 0x274   :  { %881 = vsyncpa [#allocation3], 1 }

</bundles_post_ra>
